<compile_context>
chip_gen: v7x
topology: tpu7x:2x2x1
jax: 0.10.0
libtpu: 0.0.40
codegen_flags: <defaults>
</compile_context>

<pallas_src>
import functools

import numpy as np
import jax
import jax.numpy as jnp
from jax import lax
from jax.experimental import pallas as pl
from jax.experimental.pallas import tpu as pltpu


# ---------------- Config (mirrors SCAMPLayer.__init__) ----------------
class Config:
    B = 2          # batch
    Na = 2
    Nt = 8
    Nr = 4
    Lin = 4
    Lout = 8
    K = 4
    # QPSK constellation (unit modulus)
    symbols = (np.array([1 + 1j, 1 - 1j, -1 + 1j, -1 - 1j]) / np.sqrt(2.0)).astype(
        np.complex64
    )


# derived sizes (same names as the PyTorch module)
B = Config.B
Na = Config.Na
M = Config.Nt // Config.Na     # 4
Mc = Config.Nt                 # 8
Mr = Config.Nr                 # 4
L = Config.Na * Config.Lin     # 8
Lc = Config.Lin                # 4
Lr = Config.Lout               # 8
n = Mr * Lr                    # 32
LM = Mc * Lc                   # 32
K = Config.K                   # 4

SYM = np.asarray(Config.symbols, dtype=np.complex64)
SYM_RE = np.real(SYM).astype(np.float32)
SYM_IM = np.imag(SYM).astype(np.float32)

# how many SCAMPLayer.forward applications to fuse into one pallas_call
NUM_LAYERS = 4

# lane-dense state slab layout: each field starts on a 128-lane boundary so
# every in-kernel load/store is an aligned (masked-width) access.
OFF_Z, OFF_XMAP, OFF_XM, OFF_PHI, OFF_PSI, OFF_Y = 0, 128, 256, 384, 512, 640
OUT_W = 640                    # 5 x 128 lanes written back
IN_W = 768                     # state fields + y


# ---------------- host-side constant selector / symbol matrices ----------------
def _repeat_selector(groups: int, reps: int) -> np.ndarray:
    """R[g, g*reps + r] = 1  ->  v @ R == repeat_interleave(v, reps),
                                u @ R.T == segmented sum over groups of `reps`."""
    r = np.zeros((groups, groups * reps), np.float32)
    for g in range(groups):
        r[g, g * reps:(g + 1) * reps] = 1.0
    return r


R_RN2 = np.tile(_repeat_selector(Lr, Mr), (1, 2))    # (Lr, 2n)   both re/im planes
R_CLM2 = np.tile(_repeat_selector(Lc, Mc), (1, 2))   # (Lc, 2LM)
_R_LM = _repeat_selector(L, M)                       # (L, LM)
R_LM2 = np.tile(_R_LM, (1, 2))                       # (L, 2LM)

# denoiser matrices:
#   xs  = [u_re|u_im] @ S_ALL -> (B, K*LM), xs[:, k*LM+j] = Re((s/(tau/2))_j * conj(sym_k))
#   nd  = eta @ COMB          -> (B, 128):
#         cols 0:2LM   = [sum_k Re(sym_k) eta_k | sum_k Im(sym_k) eta_k]   (numerator)
#         cols 2LM:4LM = denominator (summed over k and the group of M),
#                        already expanded back to per-element width 2LM
_I = np.eye(LM, dtype=np.float32)
S_ALL = np.zeros((2 * LM, K * LM), np.float32)
NUM_MAT = np.zeros((K * LM, 2 * LM), np.float32)
_SUMK = np.zeros((K * LM, LM), np.float32)
for k in range(K):
    S_ALL[0:LM, k * LM:(k + 1) * LM] = SYM_RE[k] * _I
    S_ALL[LM:2 * LM, k * LM:(k + 1) * LM] = SYM_IM[k] * _I
    NUM_MAT[k * LM:(k + 1) * LM, 0:LM] = SYM_RE[k] * _I
    NUM_MAT[k * LM:(k + 1) * LM, LM:2 * LM] = SYM_IM[k] * _I
    _SUMK[k * LM:(k + 1) * LM, :] = _I
DEN_MAT = (_SUMK @ _R_LM.T).astype(np.float32)       # (K*LM, L)
DEN_EXP = (DEN_MAT @ R_LM2).astype(np.float32)       # (K*LM, 2LM)  pre-expanded
COMB = np.zeros((K * LM, 4 * LM), np.float32)        # (128, 128)
COMB[:, 0:2 * LM] = NUM_MAT
COMB[:, 2 * LM:4 * LM] = DEN_EXP

# ---- one packed constant slab: 1 input DMA for all problem constants ----
# every field starts at a sublane-aligned row and lane 0
C_MAX, C_MAH, C_SALL, C_COMB, C_RRN, C_RCLM, C_W = 0, 64, 128, 192, 320, 328, 336
CONST_ROWS = 344
CONST_STATIC = np.zeros((CONST_ROWS, 128), np.float32)
CONST_STATIC[C_SALL:C_SALL + 2 * LM, 0:K * LM] = S_ALL
CONST_STATIC[C_COMB:C_COMB + K * LM, :] = COMB
CONST_STATIC[C_RRN:C_RRN + Lr, 0:2 * n] = R_RN2
CONST_STATIC[C_RCLM:C_RCLM + Lc, 0:2 * LM] = R_CLM2


# ---------------- in-kernel helpers ----------------
def _mm(a, b):
    # a @ b on the MXU, f32 accumulation
    return jnp.dot(a, b, preferred_element_type=jnp.float32)


def _mm_t(a, b):
    # a @ b.T without materialising a transpose (contract last dims)
    return lax.dot_general(
        a, b, (((1,), (1,)), ((), ())), preferred_element_type=jnp.float32
    )


def _recip(x):
    # EUP approximate reciprocal + one Newton step (avoids the wide f32 divide
    # sequence on the VALU while keeping ~f32 accuracy for the reference check).
    r = pl.reciprocal(x, approx=True)
    return r * (2.0 - x * r)


# ---------------- the Pallas kernel (num_layers fused forward passes) ----------------
def scamp_kernel(const_ref, slab_ref, sig_ref, out_ref, *, num_layers: int):
    # ---- constants: one VMEM slab, loaded once, hoisted out of the layer loop ----
    m_ax = const_ref[C_MAX:C_MAX + 2 * LM, 0:2 * n]      # [xr|xi] @ m_ax -> [Re(Ax)|Im(Ax)]
    m_ah = const_ref[C_MAH:C_MAH + 2 * n, 0:2 * LM]      # [vr|vi] @ m_ah -> [Re(A^H v)|Im(A^H v)]
    s_all = const_ref[C_SALL:C_SALL + 2 * LM, 0:K * LM]  # (2LM, K*LM)
    comb = const_ref[C_COMB:C_COMB + K * LM, :]          # (K*LM, 4LM) [num | den_expanded]
    r_rn2 = const_ref[C_RRN:C_RRN + Lr, 0:2 * n]         # (Lr, 2n)
    r_clm2 = const_ref[C_RCLM:C_RCLM + Lc, 0:2 * LM]     # (Lc, 2LM)
    w = const_ref[C_W:C_W + Lr, 0:Lc]                    # (Lr, Lc)
    sigma2 = sig_ref[0, 0]

    # ---- problem data + initial tracker state (all 128-lane-aligned fields) ----
    y_cat = slab_ref[:, OFF_Y:OFF_Y + 2 * n]
    z_cat = slab_ref[:, OFF_Z:OFF_Z + 2 * n]
    xmap_cat = slab_ref[:, OFF_XMAP:OFF_XMAP + 2 * LM]
    xm_cat = slab_ref[:, OFF_XM:OFF_XM + 2 * LM]
    phi = slab_ref[:, OFF_PHI:OFF_PHI + Lr]
    psi = slab_ref[:, OFF_PSI:OFF_PSI + Lc]
    batch = y_cat.shape[0]

    def layer(carry):
        z_cat, phi, psi, xm_cat, _ = carry

        gma = _mm_t(psi, w) * (1.0 / Lc)                      # (B, Lr)
        # exact divide on purpose: keeps gma / (+inf sentinel) == 0
        b = gma / phi                                         # (B, Lr)
        phi_new = sigma2 + gma                                # (B, Lr)
        inv_phi = _recip(phi_new)                             # reused below (EUP)
        t = _mm(inv_phi, w)                                   # (B, Lc) == W^T (1/phi)
        tau = (float(L) / float(Mr)) * _recip(t)              # (B, Lc)

        # one matmul for both Lr->2n expansions and one for both Lc->2LM ones
        e1 = _mm(jnp.concatenate([b, inv_phi], axis=0), r_rn2)    # (2B, 2n)
        e2 = _mm(jnp.concatenate([tau, t], axis=0), r_clm2)       # (2B, 2LM)
        b_use, inv_phi_use = e1[:batch], e1[batch:]
        tau_use = e2[:batch]
        # 2/tau_use recovered exactly from t -> no extra divide/reciprocal
        inv_tau_half = (2.0 * float(Mr) / float(L)) * e2[batch:]

        ax_cat = _mm(xm_cat, m_ax)                            # (B, 2n)  A @ xmmse
        z_new = y_cat - ax_cat + b_use * z_cat                # (B, 2n)
        v_cat = z_new * inv_phi_use                           # z / phi_use
        xmap_new = xm_cat + tau_use * _mm(v_cat, m_ah)        # (B, 2LM)

        # ---- denoiser: all K symbols via one matmul, one fused max, one exp,
        #      numerator + pre-expanded denominator in a single matmul ----
        u_cat = xmap_new * inv_tau_half                       # s / (tau/2)
        xs = _mm(u_cat, s_all)                                # (B, K*LM)
        eta = jnp.exp(xs - jnp.max(jnp.abs(xs)))              # single global max reduce
        nd = _mm(eta, comb)                                   # (B, 4LM)
        xm_new = nd[:, 0:2 * LM] * _recip(nd[:, 2 * LM:4 * LM])   # (B, 2LM)

        psi_new = 1.0 - _mm_t(xm_new * xm_new, r_clm2) * (1.0 / Na)   # (B, Lc)

        return (z_new, phi_new, psi_new, xm_new, xmap_new)

    # Fused AMP layer stack: state stays resident (vregs/VMEM), no HBM traffic
    # between layers.  num_layers is small & static -> trace-time unroll; for
    # large stacks switch to lax.fori_loop over the same body.
    carry = (z_cat, phi, psi, xm_cat, xmap_cat)
    for _ in range(num_layers):
        carry = layer(carry)
    z_cat, phi, psi, xm_cat, xmap_cat = carry

    # ---- single lane-dense output slab: one writeback DMA for all state ----
    out_ref[...] = jnp.zeros((batch, OUT_W), jnp.float32)
    out_ref[:, OFF_Z:OFF_Z + 2 * n] = z_cat
    out_ref[:, OFF_XMAP:OFF_XMAP + 2 * LM] = xmap_cat
    out_ref[:, OFF_XM:OFF_XM + 2 * LM] = xm_cat
    out_ref[:, OFF_PHI:OFF_PHI + Lr] = phi
    out_ref[:, OFF_PSI:OFF_PSI + Lc] = psi


# ---------------- wrapper ----------------
@functools.partial(jax.jit, static_argnames=("num_layers",))
def scamp_forward(W, A, y, z, psi, phi, xmmse, sigma2, *, num_layers=1):
    f32 = jnp.float32
    sq = lambda v: v[..., 0]                                  # (B, X, 1) -> (B, X)
    cat_ri = lambda v: jnp.concatenate(
        [sq(jnp.real(v)), sq(jnp.imag(v))], axis=-1).astype(f32)

    # block-real forms of A and A^H (built once in the wrapper, plain XLA ops)
    a_re = jnp.real(A).astype(f32)
    a_im = jnp.imag(A).astype(f32)
    m_ax = jnp.concatenate(
        [jnp.concatenate([a_re.T, a_im.T], axis=1),
         jnp.concatenate([-a_im.T, a_re.T], axis=1)], axis=0)          # (2LM, 2n)
    m_ah = jnp.concatenate(
        [jnp.concatenate([a_re, -a_im], axis=1),
         jnp.concatenate([a_im, a_re], axis=1)], axis=0)               # (2n, 2LM)

    # one packed constant slab -> a single input DMA
    const = jnp.asarray(CONST_STATIC)
    const = const.at[C_MAX:C_MAX + 2 * LM, 0:2 * n].set(m_ax)
    const = const.at[C_MAH:C_MAH + 2 * n, 0:2 * LM].set(m_ah)
    const = const.at[C_W:C_W + Lr, 0:Lc].set(W.astype(f32))

    batch = y.shape[0]
    # pack y and the mutable tracker state into one lane-dense slab
    slab = jnp.zeros((batch, IN_W), f32)
    slab = slab.at[:, OFF_Z:OFF_Z + 2 * n].set(cat_ri(z))
    slab = slab.at[:, OFF_XM:OFF_XM + 2 * LM].set(cat_ri(xmmse))
    slab = slab.at[:, OFF_PHI:OFF_PHI + Lr].set(sq(phi).astype(f32))
    slab = slab.at[:, OFF_PSI:OFF_PSI + Lc].set(sq(psi).astype(f32))
    slab = slab.at[:, OFF_Y:OFF_Y + 2 * n].set(cat_ri(y))

    vmem = pl.BlockSpec(memory_space=pltpu.MemorySpace.VMEM)
    smem = pl.BlockSpec(memory_space=pltpu.MemorySpace.SMEM)

    # TODO(synk): on v7x, once B (or the number of independent problems) grows,
    # add a leading grid axis with dimension_semantics=("parallel",) so the
    # second TensorCore is used; at B=2 a gridless single invocation is optimal.
    out = pl.pallas_call(
        functools.partial(scamp_kernel, num_layers=num_layers),
        out_shape=jax.ShapeDtypeStruct((batch, OUT_W), f32),
        in_specs=[vmem, vmem, smem],
        out_specs=vmem,
    )(const, slab, jnp.full((1, 1), sigma2, f32))

    def to_c(cat, width):
        return (cat[:, :width] + 1j * cat[:, width:2 * width]).astype(
            jnp.complex64)[..., None]

    return dict(
        z=to_c(out[:, OFF_Z:OFF_Z + 2 * n], n),
        xmap=to_c(out[:, OFF_XMAP:OFF_XMAP + 2 * LM], LM),
        xmmse=to_c(out[:, OFF_XM:OFF_XM + 2 * LM], LM),
        phi=out[:, OFF_PHI:OFF_PHI + Lr, None],
        psi=out[:, OFF_PSI:OFF_PSI + Lc, None],
    )


# ---------------- pure-JAX reference (mirrors the PyTorch forward, looped) ----------------
def scamp_reference(W, A, y, z, psi, phi, xmmse, sigma2, num_layers):
    Wf = W.astype(jnp.float32)
    sym = jnp.asarray(SYM)
    xmap = jnp.zeros_like(xmmse)
    with jax.default_matmul_precision("highest"):
        for _ in range(num_layers):
            gma = jnp.einsum("rc,bcx->brx", Wf, psi) / Lc
            b = gma / phi
            Ax = jnp.einsum("nm,bmx->bnx", A, xmmse)
            z = y - Ax + jnp.repeat(b, Mr, axis=1) * z
            phi = sigma2 + gma
            tau = L / jnp.einsum("rc,brx->bcx", Wf, 1.0 / phi) / Mr
            tau_use = jnp.repeat(tau, Mc, axis=1)
            phi_use = jnp.repeat(phi, Mr, axis=1)
            AHz = jnp.einsum("nm,bnx->bmx", jnp.conj(A), z / phi_use)
            xmap = xmmse + tau_use * AHz
            # denoiser
            s = xmap.reshape(B, L, M, 1)
            tau_d = tau_use.reshape(B, L, M, 1) / 2
            xden = jnp.real((s / tau_d) * jnp.conj(sym))             # (B, L, M, K)
            eta = jnp.exp(xden - jnp.max(jnp.abs(xden)))
            eta2 = sym * eta
            xm = eta2.sum(-1) / eta.sum(-1).sum(axis=2, keepdims=True)
            xmmse = xm.reshape(B, LM, 1).astype(jnp.complex64)
            psi = 1 - (jnp.abs(xmmse) ** 2).reshape(B, Lc, Mc).sum(
                -1, keepdims=True) / Na
    return dict(z=z, phi=phi, xmap=xmap, xmmse=xmmse, psi=psi)


if __name__ == "__main__":
    key = jax.random.PRNGKey(0)
    ks = jax.random.split(key, 8)

    def cplx(k, shape, scale=1.0):
        k1, k2 = jax.random.split(k)
        return (
            scale * (jax.random.normal(k1, shape) + 1j * jax.random.normal(k2, shape))
        ).astype(jnp.complex64)

    # Mid-iteration tracker state with finite values (the +inf phi of
    # Tracker.__init__ is only the first-iteration sentinel; the kernel keeps
    # the exact divide for b = gma/phi so that case still yields b == 0).
    W = jax.random.uniform(ks[0], (Lr, Lc), jnp.float32, 0.5, 1.5)
    A = cplx(ks[1], (n, LM), scale=1.0 / np.sqrt(2.0 * n))
    y = cplx(ks[2], (B, n, 1), scale=0.5)
    z = cplx(ks[3], (B, n, 1), scale=0.5)
    psi = jax.random.uniform(ks[4], (B, Lc, 1), jnp.float32, 0.2, 1.0)
    phi = jax.random.uniform(ks[5], (B, Lr, 1), jnp.float32, 0.5, 1.5)
    xmmse = cplx(ks[6], (B, LM, 1), scale=0.3)
    sigma2 = 0.1

    # check single-layer semantics (the original module) and the fused stack
    for layers in (1, NUM_LAYERS):
        out = scamp_forward(W, A, y, z, psi, phi, xmmse, sigma2, num_layers=layers)
        out = jax.tree_util.tree_map(jax.block_until_ready, out)
        ref = scamp_reference(W, A, y, z, psi, phi, xmmse, sigma2, layers)
        for name in ("z", "phi", "xmap", "xmmse", "psi"):
            # tolerance covers MXU rounding of the reassociated (selector-matmul)
            # formulation accumulated across the fused iterations
            np.testing.assert_allclose(
                np.asarray(out[name]), np.asarray(ref[name]), rtol=2e-2, atol=1e-2
            )

    print("KERNEL_OK")
</pallas_src>

<mosaic_0001>
module attributes {stable_mosaic.version = 11 : i64} {
  func.func @scamp_kernel(%arg0: memref<344x128xf32, #tpu.memory_space<vmem>>, %arg1: memref<2x768xf32, #tpu.memory_space<vmem>>, %arg2: memref<1x1xf32, #tpu.memory_space<smem>>, %arg3: memref<2x640xf32, #tpu.memory_space<vmem>>) attributes {dimension_semantics = [], scalar_prefetch = 0 : i64, scratch_operands = 0 : i64, tpu.core_type = #tpu.core_type<tc>} {
    %c0 = arith.constant 0 : index
    %c0_0 = arith.constant 0 : index
    %0 = vector.load %arg0[%c0, %c0_0] : memref<344x128xf32, #tpu.memory_space<vmem>>, vector<64x64xf32>
    %c64 = arith.constant 64 : index
    %c0_1 = arith.constant 0 : index
    %1 = vector.load %arg0[%c64, %c0_1] : memref<344x128xf32, #tpu.memory_space<vmem>>, vector<64x64xf32>
    %c128 = arith.constant 128 : index
    %c0_2 = arith.constant 0 : index
    %2 = vector.load %arg0[%c128, %c0_2] : memref<344x128xf32, #tpu.memory_space<vmem>>, vector<64x128xf32>
    %c192 = arith.constant 192 : index
    %c0_3 = arith.constant 0 : index
    %3 = vector.load %arg0[%c192, %c0_3] : memref<344x128xf32, #tpu.memory_space<vmem>>, vector<128x128xf32>
    %c320 = arith.constant 320 : index
    %c0_4 = arith.constant 0 : index
    %4 = vector.load %arg0[%c320, %c0_4] : memref<344x128xf32, #tpu.memory_space<vmem>>, vector<8x64xf32>
    %c328 = arith.constant 328 : index
    %c0_5 = arith.constant 0 : index
    %5 = vector.load %arg0[%c328, %c0_5] : memref<344x128xf32, #tpu.memory_space<vmem>>, vector<4x64xf32>
    %c336 = arith.constant 336 : index
    %c0_6 = arith.constant 0 : index
    %6 = vector.load %arg0[%c336, %c0_6] : memref<344x128xf32, #tpu.memory_space<vmem>>, vector<8x4xf32>
    %c0_7 = arith.constant 0 : index
    %c0_8 = arith.constant 0 : index
    %7 = memref.load %arg2[%c0_7, %c0_8] : memref<1x1xf32, #tpu.memory_space<smem>>
    %c0_9 = arith.constant 0 : index
    %c640 = arith.constant 640 : index
    %8 = vector.load %arg1[%c0_9, %c640] : memref<2x768xf32, #tpu.memory_space<vmem>>, vector<2x64xf32>
    %c0_10 = arith.constant 0 : index
    %c0_11 = arith.constant 0 : index
    %9 = vector.load %arg1[%c0_10, %c0_11] : memref<2x768xf32, #tpu.memory_space<vmem>>, vector<2x64xf32>
    %c0_12 = arith.constant 0 : index
    %c256 = arith.constant 256 : index
    %10 = vector.load %arg1[%c0_12, %c256] : memref<2x768xf32, #tpu.memory_space<vmem>>, vector<2x64xf32>
    %c0_13 = arith.constant 0 : index
    %c384 = arith.constant 384 : index
    %11 = vector.load %arg1[%c0_13, %c384] : memref<2x768xf32, #tpu.memory_space<vmem>>, vector<2x8xf32>
    %c0_14 = arith.constant 0 : index
    %c512 = arith.constant 512 : index
    %12 = vector.load %arg1[%c0_14, %c512] : memref<2x768xf32, #tpu.memory_space<vmem>>, vector<2x4xf32>
    %cst = arith.constant dense<0.000000e+00> : vector<2x8xf32>
    %13 = tpu.matmul %12, %6, %cst {dimension_numbers = #tpu.dot_dimension_numbers<[1], [1], [0], [0], [0, 0, 1, 0], [], []>} : vector<2x4xf32>, vector<8x4xf32>, vector<2x8xf32> -> vector<2x8xf32>
    %cst_15 = arith.constant 2.500000e-01 : f32
    %14 = vector.broadcast %cst_15 : f32 to vector<2x8xf32>
    %15 = arith.mulf %13, %14 : vector<2x8xf32>
    %16 = arith.divf %15, %11 : vector<2x8xf32>
    %17 = vector.broadcast %7 : f32 to vector<2x8xf32>
    %18 = arith.addf %17, %15 : vector<2x8xf32>
    %19 = tpu.reciprocal %18 {approx = true} : vector<2x8xf32> -> vector<2x8xf32>
    %20 = arith.mulf %18, %19 : vector<2x8xf32>
    %cst_16 = arith.constant 2.000000e+00 : f32
    %21 = vector.broadcast %cst_16 : f32 to vector<2x8xf32>
    %22 = arith.subf %21, %20 : vector<2x8xf32>
    %23 = arith.mulf %19, %22 : vector<2x8xf32>
    %cst_17 = arith.constant dense<0.000000e+00> : vector<2x4xf32>
    %24 = tpu.matmul %23, %6, %cst_17 {dimension_numbers = #tpu.dot_dimension_numbers<[1], [0], [0], [1], [0, 0, 1, 1], [], []>} : vector<2x8xf32>, vector<8x4xf32>, vector<2x4xf32> -> vector<2x4xf32>
    %25 = tpu.reciprocal %24 {approx = true} : vector<2x4xf32> -> vector<2x4xf32>
    %26 = arith.mulf %24, %25 : vector<2x4xf32>
    %cst_18 = arith.constant 2.000000e+00 : f32
    %27 = vector.broadcast %cst_18 : f32 to vector<2x4xf32>
    %28 = arith.subf %27, %26 : vector<2x4xf32>
    %29 = arith.mulf %25, %28 : vector<2x4xf32>
    %cst_19 = arith.constant 2.000000e+00 : f32
    %30 = vector.broadcast %cst_19 : f32 to vector<2x4xf32>
    %31 = arith.mulf %30, %29 : vector<2x4xf32>
    %32 = tpu.concatenate %16, %23 in 0 : vector<2x8xf32>, vector<2x8xf32> -> vector<4x8xf32>
    %cst_20 = arith.constant dense<0.000000e+00> : vector<4x64xf32>
    %33 = tpu.matmul %32, %4, %cst_20 {dimension_numbers = #tpu.dot_dimension_numbers<[1], [0], [0], [1], [0, 0, 1, 1], [], []>} : vector<4x8xf32>, vector<8x64xf32>, vector<4x64xf32> -> vector<4x64xf32>
    %34 = tpu.concatenate %31, %24 in 0 : vector<2x4xf32>, vector<2x4xf32> -> vector<4x4xf32>
    %cst_21 = arith.constant dense<0.000000e+00> : vector<4x64xf32>
    %35 = tpu.matmul %34, %5, %cst_21 {dimension_numbers = #tpu.dot_dimension_numbers<[1], [0], [0], [1], [0, 0, 1, 1], [], []>} : vector<4x4xf32>, vector<4x64xf32>, vector<4x64xf32> -> vector<4x64xf32>
    %36 = vector.extract_strided_slice %33 {offsets = [0, 0], sizes = [2, 64], strides = [1, 1]} : vector<4x64xf32> to vector<2x64xf32>
    %37 = vector.extract_strided_slice %33 {offsets = [2, 0], sizes = [2, 64], strides = [1, 1]} : vector<4x64xf32> to vector<2x64xf32>
    %38 = vector.extract_strided_slice %35 {offsets = [0, 0], sizes = [2, 64], strides = [1, 1]} : vector<4x64xf32> to vector<2x64xf32>
    %39 = vector.extract_strided_slice %35 {offsets = [2, 0], sizes = [2, 64], strides = [1, 1]} : vector<4x64xf32> to vector<2x64xf32>
    %cst_22 = arith.constant 1.000000e+00 : f32
    %40 = vector.broadcast %cst_22 : f32 to vector<2x64xf32>
    %41 = arith.mulf %40, %39 : vector<2x64xf32>
    %cst_23 = arith.constant dense<0.000000e+00> : vector<2x64xf32>
    %42 = tpu.matmul %10, %0, %cst_23 {dimension_numbers = #tpu.dot_dimension_numbers<[1], [0], [0], [1], [0, 0, 1, 1], [], []>} : vector<2x64xf32>, vector<64x64xf32>, vector<2x64xf32> -> vector<2x64xf32>
    %43 = arith.subf %8, %42 : vector<2x64xf32>
    %44 = arith.mulf %36, %9 : vector<2x64xf32>
    %45 = arith.addf %43, %44 : vector<2x64xf32>
    %46 = arith.mulf %45, %37 : vector<2x64xf32>
    %cst_24 = arith.constant dense<0.000000e+00> : vector<2x64xf32>
    %47 = tpu.matmul %46, %1, %cst_24 {dimension_numbers = #tpu.dot_dimension_numbers<[1], [0], [0], [1], [0, 0, 1, 1], [], []>} : vector<2x64xf32>, vector<64x64xf32>, vector<2x64xf32> -> vector<2x64xf32>
    %48 = arith.mulf %38, %47 : vector<2x64xf32>
    %49 = arith.addf %10, %48 : vector<2x64xf32>
    %50 = arith.mulf %49, %41 : vector<2x64xf32>
    %cst_25 = arith.constant dense<0.000000e+00> : vector<2x128xf32>
    %51 = tpu.matmul %50, %2, %cst_25 {dimension_numbers = #tpu.dot_dimension_numbers<[1], [0], [0], [1], [0, 0, 1, 1], [], []>} : vector<2x64xf32>, vector<64x128xf32>, vector<2x128xf32> -> vector<2x128xf32>
    %52 = math.absf %51 : vector<2x128xf32>
    %53 = vector.shape_cast %52 : vector<2x128xf32> to vector<1x2x128xf32>
    %cst_26 = arith.constant dense<0xFF800000> : vector<1xf32>
    %54 = vector.multi_reduction <maximumf>, %53, %cst_26 [1, 2] : vector<1x2x128xf32> to vector<1xf32>
    %55 = vector.shape_cast %54 : vector<1xf32> to vector<1x1x1xf32>
    %56 = vector.extract %55[0, 0, 0] : f32 from vector<1x1x1xf32>
    %57 = vector.broadcast %56 : f32 to vector<2x128xf32>
    %58 = arith.subf %51, %57 : vector<2x128xf32>
    %59 = math.exp %58 : vector<2x128xf32>
    %cst_27 = arith.constant dense<0.000000e+00> : vector<2x128xf32>
    %60 = tpu.matmul %59, %3, %cst_27 {dimension_numbers = #tpu.dot_dimension_numbers<[1], [0], [0], [1], [0, 0, 1, 1], [], []>} : vector<2x128xf32>, vector<128x128xf32>, vector<2x128xf32> -> vector<2x128xf32>
    %61 = vector.extract_strided_slice %60 {offsets = [0, 0], sizes = [2, 64], strides = [1, 1]} : vector<2x128xf32> to vector<2x64xf32>
    %62 = vector.extract_strided_slice %60 {offsets = [0, 64], sizes = [2, 64], strides = [1, 1]} : vector<2x128xf32> to vector<2x64xf32>
    %63 = tpu.reciprocal %62 {approx = true} : vector<2x64xf32> -> vector<2x64xf32>
    %64 = arith.mulf %62, %63 : vector<2x64xf32>
    %cst_28 = arith.constant 2.000000e+00 : f32
    %65 = vector.broadcast %cst_28 : f32 to vector<2x64xf32>
    %66 = arith.subf %65, %64 : vector<2x64xf32>
    %67 = arith.mulf %63, %66 : vector<2x64xf32>
    %68 = arith.mulf %61, %67 : vector<2x64xf32>
    %69 = arith.mulf %68, %68 : vector<2x64xf32>
    %cst_29 = arith.constant dense<0.000000e+00> : vector<2x4xf32>
    %70 = tpu.matmul %69, %5, %cst_29 {dimension_numbers = #tpu.dot_dimension_numbers<[1], [1], [0], [0], [0, 0, 1, 0], [], []>} : vector<2x64xf32>, vector<4x64xf32>, vector<2x4xf32> -> vector<2x4xf32>
    %cst_30 = arith.constant 5.000000e-01 : f32
    %71 = vector.broadcast %cst_30 : f32 to vector<2x4xf32>
    %72 = arith.mulf %70, %71 : vector<2x4xf32>
    %cst_31 = arith.constant 1.000000e+00 : f32
    %73 = vector.broadcast %cst_31 : f32 to vector<2x4xf32>
    %74 = arith.subf %73, %72 : vector<2x4xf32>
    %cst_32 = arith.constant 0.000000e+00 : f32
    %75 = vector.broadcast %cst_32 : f32 to vector<2x640xf32>
    %c0_33 = arith.constant 0 : index
    %c0_34 = arith.constant 0 : index
    %76 = vector.load %arg3[%c0_33, %c0_34] : memref<2x640xf32, #tpu.memory_space<vmem>>, vector<2x640xf32>
    tpu.vector_store %arg3[%c0_33, %c0_34], %75 {strides = array<i32>} : memref<2x640xf32, #tpu.memory_space<vmem>>, vector<2x640xf32>,
    %c0_35 = arith.constant 0 : index
    %c0_36 = arith.constant 0 : index
    %77 = vector.load %arg3[%c0_35, %c0_36] : memref<2x640xf32, #tpu.memory_space<vmem>>, vector<2x64xf32>
    tpu.vector_store %arg3[%c0_35, %c0_36], %45 {strides = array<i32>} : memref<2x640xf32, #tpu.memory_space<vmem>>, vector<2x64xf32>,
    %c0_37 = arith.constant 0 : index
    %c128_38 = arith.constant 128 : index
    %78 = vector.load %arg3[%c0_37, %c128_38] : memref<2x640xf32, #tpu.memory_space<vmem>>, vector<2x64xf32>
    tpu.vector_store %arg3[%c0_37, %c128_38], %49 {strides = array<i32>} : memref<2x640xf32, #tpu.memory_space<vmem>>, vector<2x64xf32>,
    %c0_39 = arith.constant 0 : index
    %c256_40 = arith.constant 256 : index
    %79 = vector.load %arg3[%c0_39, %c256_40] : memref<2x640xf32, #tpu.memory_space<vmem>>, vector<2x64xf32>
    tpu.vector_store %arg3[%c0_39, %c256_40], %68 {strides = array<i32>} : memref<2x640xf32, #tpu.memory_space<vmem>>, vector<2x64xf32>,
    %c0_41 = arith.constant 0 : index
    %c384_42 = arith.constant 384 : index
    %80 = vector.load %arg3[%c0_41, %c384_42] : memref<2x640xf32, #tpu.memory_space<vmem>>, vector<2x8xf32>
    tpu.vector_store %arg3[%c0_41, %c384_42], %18 {strides = array<i32>} : memref<2x640xf32, #tpu.memory_space<vmem>>, vector<2x8xf32>,
    %c0_43 = arith.constant 0 : index
    %c512_44 = arith.constant 512 : index
    %81 = vector.load %arg3[%c0_43, %c512_44] : memref<2x640xf32, #tpu.memory_space<vmem>>, vector<2x4xf32>
    tpu.vector_store %arg3[%c0_43, %c512_44], %74 {strides = array<i32>} : memref<2x640xf32, #tpu.memory_space<vmem>>, vector<2x4xf32>,
    return
  }
}

</mosaic_0001>

<bundles_post_ra>
// kernel: custom-call
= control target key start
LH: loop header
LB: loop body
LE: loop exit
PB: predicated region body
PF: predicated region fallthrough
CT: control target
= control target key end

     0   :  { %2 = vsyncpa [#allocation0], 0  ;;  %s61_s0 = inlined_call_operand.hbm [shape: c64[32,32], index: 0, kind: input, shape index: {}]   ;;  %s62_s1 = inlined_call_operand.vmem [shape: f32[32,32], index: 1, kind: output, shape index: {}]  }
   0x1   :  { %s3_s8 = sshll.u32 %s62_s1, 4  ;;  %s9_s11 = scalar_lea.hbm %s61_s0, 512  ;;  %s4_s8 = int_to_ptr.vmem [resolvable:$true] %s3_s8 }
   0x2   :  { %p10_p0 = scmp.ne.s32.totalorder %s61_s0, %s9_s11  ;;  %s11_s16 = scalar_lea.hbm %s61_s0, 1024 }
   0x3   :  { %p12_p1 = scmp.lt.u32.totalorder %s11_s16, %s9_s11  ;;  %p13_p2 = scmp.lt.u32.totalorder %s9_s11, %s61_s0 }
   0x5   :  { %p14_p3 = por %p13_p2, %p12_p1 }
   0x7   :  { %p15_p4 = pnand %p14_p3, %p10_p0 }
   0x9   :  { %18 = shalt.err (!%p15_p4)  }
   0xa   :  { %s19_s1 = scalar_lea.vmem %s4_s8, 512  ;;  %p24_p6 = scmp.lt.s32.totalorder %s4_s8, %s4_s8 }
   0xb   :  { %p20_p5 = scmp.ne.s32.totalorder %s4_s8, %s19_s1  ;;  %p25_p7 = scmp.lt.s32.totalorder %s19_s1, %s19_s1 }
   0xd   :  { %p26_p8 = por %p25_p7, %p24_p6 }
   0xf   :  { %p27_p9 = pnand %p26_p8, %p20_p5 }
  0x11   :  { %30 = shalt.err (!%p27_p9)  }
  0x12   :  { %6 = dma.hbm_to_vmem [thread:$0]  %s61_s0, 512, %s4_s8, [#allocation0] }
  0x13   :  { %31 = dma.done.wait [#allocation0], 512  }
  0x14   :  { %32 = vsyncadd [#allocation0], 4294966784 }
  0x15   :  { %8 = vsyncpa [#allocation0], 1 }

// kernel: custom-call.1
= control target key start
LH: loop header
LB: loop body
LE: loop exit
PB: predicated region body
PF: predicated region fallthrough
CT: control target
= control target key end

     0   :  { %s59_s0 = inlined_call_operand.hbm [shape: c64[32,32], index: 0, kind: input, shape index: {}]   ;;  %s60_s1 = inlined_call_operand.vmem [shape: f32[32,32], index: 1, kind: output, shape index: {}]  }
   0x1   :  { %s2_s8 = scalar_lea.hbm %s59_s0, 512 }
   0x2   :  { %3 = vsyncpa [#allocation0], 0  ;;  %s4_s11 = sshll.u32 %s60_s1, 4  ;;  %s34_s14 = scalar_lea.hbm %s59_s0, 1024  ;;  %s5_s11 = int_to_ptr.vmem [resolvable:$true] %s4_s11 }
   0x3   :  { %p11_p0 = scmp.ne.s32.totalorder %s2_s8, %s34_s14  ;;  %p13_p1 = scmp.lt.u32.totalorder %s2_s8, %s59_s0 }
   0x4   :  { %p14_p2 = scmp.lt.u32.totalorder %s34_s14, %s34_s14  ;;  %p16_p4 = scmp.lt.u32.totalorder %s34_s14, %s2_s8 }
   0x6   :  { %p15_p3 = por %p14_p2, %p13_p1 }
   0x8   :  { %p17_p5 = por %p16_p4, %p15_p3 }
   0xa   :  { %p18_p6 = pnand %p17_p5, %p11_p0 }
   0xc   :  { %21 = shalt.err (!%p18_p6)  }
   0xd   :  { %s22_s17 = scalar_lea.vmem %s5_s11, 512  ;;  %p27_p8 = scmp.lt.s32.totalorder %s5_s11, %s5_s11 }
   0xe   :  { %p23_p7 = scmp.ne.s32.totalorder %s5_s11, %s22_s17  ;;  %p28_p9 = scmp.lt.s32.totalorder %s22_s17, %s22_s17 }
  0x10   :  { %p29_p10 = por %p28_p9, %p27_p8 }
  0x12   :  { %p30_p11 = pnand %p29_p10, %p23_p7 }
  0x14   :  { %33 = shalt.err (!%p30_p11)  }
  0x15   :  { %7 = dma.hbm_to_vmem [thread:$0]  %s2_s8, 512, %s5_s11, [#allocation0] }
  0x16   :  { %35 = dma.done.wait [#allocation0], 512  }
  0x17   :  { %36 = vsyncadd [#allocation0], 4294966784 }
  0x18   :  { %9 = vsyncpa [#allocation0], 1 }

// kernel: neg.3
= control target key start
LH: loop header
LB: loop body
LE: loop exit
PB: predicated region body
PF: predicated region fallthrough
CT: control target
= control target key end

     0   :  { %s72_s0 = inlined_call_operand.vmem [shape: f32[32,32], index: 0, kind: input, shape index: {}]   ;;  %s73_s1 = inlined_call_operand.vmem [shape: f32[32,32], index: 1, kind: output, shape index: {}]  }
   0x1   :  { %v2_v0 = vld [vmem:[%s72_s0] sm:$0xff]  ;;  %v32_v1 = vld [vmem:[%s72_s0 + $0x8] sm:$0xff]  ;;  %v34_v2 = vld [vmem:[%s72_s0 + $0x10] sm:$0xff] }
   0x2   :  { %v5_v3 = vxor.u32 2147483648, %v2_v0  ;;  %v12_v4 = vxor.u32 2147483648, %v32_v1  ;;  %v20_v5 = vxor.u32 2147483648, %v34_v2  ;;  %v36_v6 = vld [vmem:[%s72_s0 + $0x18] sm:$0xff] }
   0x3   :  { %v28_v7 = vxor.u32 2147483648, %v36_v6 }
   0x4   :  { %7 = vst [vmem:[%s73_s1] sm:$0xff] %v5_v3  ;;  %33 = vst [vmem:[%s73_s1 + $0x8] sm:$0xff] %v12_v4 }
   0x5   :  { %35 = vst [vmem:[%s73_s1 + $0x10] sm:$0xff] %v20_v5  ;;  %37 = vst [vmem:[%s73_s1 + $0x18] sm:$0xff] %v28_v7 }

// kernel: custom-call.2
= control target key start
LH: loop header
LB: loop body
LE: loop exit
PB: predicated region body
PF: predicated region fallthrough
CT: control target
= control target key end

     0   :  { %2 = vsyncpa [#allocation0], 0  ;;  %s61_s0 = inlined_call_operand.hbm [shape: c64[2,32,1], index: 0, kind: input, shape index: {}]   ;;  %s62_s1 = inlined_call_operand.vmem [shape: f32[2,32,1], index: 1, kind: output, shape index: {}]  }
   0x1   :  { %s3_s8 = sshll.u32 %s62_s1, 4  ;;  %s9_s11 = scalar_lea.hbm %s61_s0, 32  ;;  %s4_s8 = int_to_ptr.vmem [resolvable:$true] %s3_s8 }
   0x2   :  { %p10_p0 = scmp.ne.s32.totalorder %s61_s0, %s9_s11  ;;  %s11_s16 = scalar_lea.hbm %s61_s0, 64 }
   0x3   :  { %p12_p1 = scmp.lt.u32.totalorder %s11_s16, %s9_s11  ;;  %p13_p2 = scmp.lt.u32.totalorder %s9_s11, %s61_s0 }
   0x5   :  { %p14_p3 = por %p13_p2, %p12_p1 }
   0x7   :  { %p15_p4 = pnand %p14_p3, %p10_p0 }
   0x9   :  { %18 = shalt.err (!%p15_p4)  }
   0xa   :  { %s19_s1 = scalar_lea.vmem %s4_s8, 32  ;;  %p24_p6 = scmp.lt.s32.totalorder %s4_s8, %s4_s8 }
   0xb   :  { %p20_p5 = scmp.ne.s32.totalorder %s4_s8, %s19_s1  ;;  %p25_p7 = scmp.lt.s32.totalorder %s19_s1, %s19_s1 }
   0xd   :  { %p26_p8 = por %p25_p7, %p24_p6 }
   0xf   :  { %p27_p9 = pnand %p26_p8, %p20_p5 }
  0x11   :  { %30 = shalt.err (!%p27_p9)  }
  0x12   :  { %6 = dma.hbm_to_vmem [thread:$0]  %s61_s0, 32, %s4_s8, [#allocation0] }
  0x13   :  { %31 = dma.done.wait [#allocation0], 32  }
  0x14   :  { %32 = vsyncadd [#allocation0], 4294967264 }
  0x15   :  { %8 = vsyncpa [#allocation0], 1 }

// kernel: custom-call.3
= control target key start
LH: loop header
LB: loop body
LE: loop exit
PB: predicated region body
PF: predicated region fallthrough
CT: control target
= control target key end

     0   :  { %s59_s0 = inlined_call_operand.hbm [shape: c64[2,32,1], index: 0, kind: input, shape index: {}]   ;;  %s60_s1 = inlined_call_operand.vmem [shape: f32[2,32,1], index: 1, kind: output, shape index: {}]  }
   0x1   :  { %s2_s8 = scalar_lea.hbm %s59_s0, 32 }
   0x2   :  { %3 = vsyncpa [#allocation0], 0  ;;  %s4_s11 = sshll.u32 %s60_s1, 4  ;;  %s34_s14 = scalar_lea.hbm %s59_s0, 64  ;;  %s5_s11 = int_to_ptr.vmem [resolvable:$true] %s4_s11 }
   0x3   :  { %p11_p0 = scmp.ne.s32.totalorder %s2_s8, %s34_s14  ;;  %p13_p1 = scmp.lt.u32.totalorder %s2_s8, %s59_s0 }
   0x4   :  { %p14_p2 = scmp.lt.u32.totalorder %s34_s14, %s34_s14  ;;  %p16_p4 = scmp.lt.u32.totalorder %s34_s14, %s2_s8 }
   0x6   :  { %p15_p3 = por %p14_p2, %p13_p1 }
   0x8   :  { %p17_p5 = por %p16_p4, %p15_p3 }
   0xa   :  { %p18_p6 = pnand %p17_p5, %p11_p0 }
   0xc   :  { %21 = shalt.err (!%p18_p6)  }
   0xd   :  { %s22_s17 = scalar_lea.vmem %s5_s11, 32  ;;  %p27_p8 = scmp.lt.s32.totalorder %s5_s11, %s5_s11 }
   0xe   :  { %p23_p7 = scmp.ne.s32.totalorder %s5_s11, %s22_s17  ;;  %p28_p9 = scmp.lt.s32.totalorder %s22_s17, %s22_s17 }
  0x10   :  { %p29_p10 = por %p28_p9, %p27_p8 }
  0x12   :  { %p30_p11 = pnand %p29_p10, %p23_p7 }
  0x14   :  { %33 = shalt.err (!%p30_p11)  }
  0x15   :  { %7 = dma.hbm_to_vmem [thread:$0]  %s2_s8, 32, %s5_s11, [#allocation0] }
  0x16   :  { %35 = dma.done.wait [#allocation0], 32  }
  0x17   :  { %36 = vsyncadd [#allocation0], 4294967264 }
  0x18   :  { %9 = vsyncpa [#allocation0], 1 }

// kernel: custom-call.10
= control target key start
LH: loop header
LB: loop body
LE: loop exit
PB: predicated region body
PF: predicated region fallthrough
CT: control target
= control target key end

     0   :  { %s126_s0 = inlined_call_operand.vmem [shape: f32[2,32,1], index: 0, kind: input, shape index: {}]   ;;  %s127_s1 = inlined_call_operand.vmem [shape: f32[2,32,1], index: 1, kind: input, shape index: {}]   ;;  %s128_s2 = inlined_call_operand.hbm [shape: c64[2,32,1], index: 2, kind: output, shape index: {}]  }
   0x1   :  { %s87_s11 = scalar_lea.hbm %s128_s2, 32 }
   0x2   :  { %4 = vsyncpa [#allocation0], 0  ;;  %s5_s14 = sshll.u32 %s126_s0, 4  ;;  %s6_s14 = int_to_ptr.vmem [resolvable:$true] %s5_s14 }
   0x3   :  { %s18_s15 = scalar_lea.vmem %s6_s14, 32  ;;  %p23_p1 = scmp.lt.s32.totalorder %s6_s14, %s6_s14 }
   0x4   :  { %p19_p0 = scmp.ne.s32.totalorder %s6_s14, %s18_s15  ;;  %p24_p2 = scmp.lt.s32.totalorder %s18_s15, %s18_s15 }
   0x6   :  { %p25_p3 = por %p24_p2, %p23_p1 }
   0x8   :  { %p26_p4 = pnand %p25_p3, %p19_p0 }
   0xa   :  { %29 = shalt.err (!%p26_p4)  }
   0xb   :  { %p31_p5 = scmp.ne.s32.totalorder %s128_s2, %s87_s11  ;;  %s32_s0 = scalar_lea.hbm %s128_s2, 64 }
   0xc   :  { %p33_p6 = scmp.lt.u32.totalorder %s32_s0, %s87_s11  ;;  %p34_p7 = scmp.lt.u32.totalorder %s87_s11, %s128_s2 }
   0xe   :  { %p35_p8 = por %p34_p7, %p33_p6 }
  0x10   :  { %p36_p9 = pnand %p35_p8, %p31_p5 }
  0x12   :  { %39 = shalt.err (!%p36_p9)  }
  0x13   :  { %8 = dma.vmem_to_hbm [thread:$0]  %s6_s14, 32, %s128_s2, [#allocation0] }
  0x14   :  { %65 = dma.done.wait [#allocation0], 32  }
  0x15   :  { %66 = vsyncadd [#allocation0], 4294967264 }
  0x16   :  { %10 = vsyncpa [#allocation0], 1 }
  0x17   :  { %11 = vsyncpa [#allocation1], 0  ;;  %s12_s28 = sshll.u32 %s127_s1, 4  ;;  %s13_s28 = int_to_ptr.vmem [resolvable:$true] %s12_s28 }
  0x18   :  { %s40_s29 = scalar_lea.vmem %s13_s28, 32  ;;  %p45_p11 = scmp.lt.s32.totalorder %s13_s28, %s13_s28 }
  0x19   :  { %p41_p10 = scmp.ne.s32.totalorder %s13_s28, %s40_s29  ;;  %p46_p12 = scmp.lt.s32.totalorder %s40_s29, %s40_s29 }
  0x1b   :  { %p47_p13 = por %p46_p12, %p45_p11 }
  0x1d   :  { %p48_p0 = pnand %p47_p13, %p41_p10 }
  0x1f   :  { %51 = shalt.err (!%p48_p0)  }
  0x20   :  { %p53_p1 = scmp.ne.s32.totalorder %s87_s11, %s32_s0  ;;  %p56_p2 = scmp.lt.u32.totalorder %s32_s0, %s32_s0 }
  0x22   :  { %p57_p3 = por %p56_p2, %p34_p7 }
  0x24   :  { %p59_p4 = por %p57_p3, %p33_p6 }
  0x26   :  { %p60_p5 = pnand %p59_p4, %p53_p1 }
  0x28   :  { %63 = shalt.err (!%p60_p5)  }
  0x29   :  { %15 = dma.vmem_to_hbm [thread:$0]  %s13_s28, 32, %s87_s11, [#allocation1] }
  0x2a   :  { %67 = dma.done.wait [#allocation1], 32  }
  0x2b   :  { %68 = vsyncadd [#allocation1], 4294967264 }
  0x2c   :  { %17 = vsyncpa [#allocation1], 1 }

// kernel: scamp_forward.1
= control target key start
LH: loop header
LB: loop body
LE: loop exit
PB: predicated region body
PF: predicated region fallthrough
CT: control target
= control target key end

     0   :  { %vm64_vm0 = vcmask 31744   ;;  %v1079_v0 = vmov 0.0   ;;  %vm1080_vm1 = vmmov 0   ;;  %vm812_vm2 = vcmask 58368   ;;  %s1345_s0 = inlined_call_operand.vmem [shape: f32[344,128], index: 0, kind: input, shape index: {}]   ;;  %s1346_s1 = inlined_call_operand.vmem [shape: f32[2,768], index: 1, kind: input, shape index: {}]   ;;  %s1347_s3 = inlined_call_operand.vmem [shape: f32[2,640], index: 3, kind: output, shape index: {}]   ;;  %s1348_s2 = inlined_call_operand.<no memory space> [shape: f32[1,1], index: 2, kind: input, shape index: {}]  }
   0x1   :  { %885 = vmatprep.subr.mxu1 %v1079_v0  ;;  %v57_v1 = vld [vmem:[%s1345_s0 + $0x150] sm:$0xff]  ;;  %887 = vmatprep.mubr.msk.f32.mxu1 %vm1080_vm1, %v1079_v0  ;;  %806 = vst [vmem:[%s1347_s3] sm:$0xff] %v1079_v0  ;;  %807 = vst [vmem:[%s1347_s3 + $0x8] sm:$0x3] %v1079_v0  ;;  %v63_v2 = vld [vmem:[%s1346_s1 + $0x8] sm:$0x3]  ;;  %vm150_vm3 = vcmask 64512   ;;  %v468_v39 = vlaneseq }
   0x2   :  { %886 = vmatpush3.xpose.msk.msra.mxu1 %vm64_vm0, %v57_v1  ;;  %900 = vmatprep.subr.mxu0 %v1079_v0  ;;  %v144_v4 = vstv %s1348_s2  ;;  %v62_v8 = vld [vmem:[%s1346_s1 + $0x6] sm:$0x3]  ;;  %v16_v16 = vld [vmem:[%s1345_s0 + $0x8] sm:$0xff]  ;;  %vm231_vm4 = vcmask 1041408   ;;  %v1081_v20 = vmov 0.0|0.0   ;;  %v17_v22 = vld [vmem:[%s1345_s0 + $0x10] sm:$0xff] }
   0x3   :  { %890 = vmatprep.subr.mxu1 %v1079_v0  ;;  %902 = vmatprep.mubr.msk.f32.mxu0 %vm1080_vm1, %v1079_v0  ;;  %v55_v14 = vld [vmem:[%s1345_s0 + $0x140] sm:$0xff]  ;;  %v18_v23 = vld [vmem:[%s1345_s0 + $0x18] sm:$0xff]  ;;  %v20_v26 = vld [vmem:[%s1345_s0 + $0x28] sm:$0xff]  ;;  %vm387_vm5 = vcmask 523264   ;;  %vm313_vm6 = vcmask 1043456   ;;  %v469_v42 = vshrl.u32 %v468_v39, 7 }
   0x4   :  { %v15_v15 = vld [vmem:[%s1345_s0] sm:$0xff]  ;;  %v1006_v24 = vpack.c.bf16 %v18_v23, %v17_v22  ;;  %v21_v28 = vld [vmem:[%s1345_s0 + $0x30] sm:$0xff]  ;;  %v22_v29 = vld [vmem:[%s1345_s0 + $0x38] sm:$0xff]  ;;  %v1082_v37 = vmov 1983009808   ;;  %vm808_vm7 = vcmask 517120  }
   0x5   :  { %888 = vmatmul.mubr.msk.f32.vlgmr.msra.gmra.mrb[0].mxu1 %vm64_vm0, %v63_v2  ;;  %v1003_v19 = vpack.c.bf16 %v16_v16, %v15_v15  ;;  %v19_v25 = vld [vmem:[%s1345_s0 + $0x20] sm:$0xff]  ;;  %v1012_v30 = vpack.c.bf16 %v22_v29, %v21_v28  ;;  %v1190_v32 = vld [vmem:[%s1345_s0 + $0x148] sm:$0xf]  ;;  %v466_v38 = vunpack.c.l.s4 %v1082_v37  ;;  %v25_v55 = vld [vmem:[%s1345_s0 + $0x50] sm:$0xff]  ;;  %vm814_vm8 = vcmask 25600  }
   0x6   :  { %891 = vmatpush3.msra.mxu1 %v57_v1  ;;  %892 = vmatprep.mubr.msk.f32.mxu1 %vm1080_vm1, %v1079_v0  ;;  %v1009_v27 = vpack.c.bf16 %v20_v26, %v19_v25  ;;  %v1180_v31 = vld [vmem:[%s1346_s1 + $0x4] sm:$0x3]  ;;  %v24_v47 = vld [vmem:[%s1345_s0 + $0x48] sm:$0xff]  ;;  %v60_v51 = vld [vmem:[%s1346_s1] sm:$0x3] }
   0x7   :  { %895 = vmatprep.subr.mxu1 %v1079_v0  ;;  %901 = vmatpush3.msk.msra.mxu0 %vm313_vm6, %v1190_v32  ;;  %v467_v41 = vunpack.c.0.s8 %v466_v38  ;;  %v23_v46 = vld [vmem:[%s1345_s0 + $0x40] sm:$0xff]  ;;  %v59_v52 = vld [vmem:[%s1346_s1 + $0xa] sm:$0x3]  ;;  %v26_v56 = vld [vmem:[%s1345_s0 + $0x58] sm:$0xff] }
   0x8   :  { %1014 = vmatprep.subr.bf16.mxu0 %v1081_v20  ;;  %v1015_v53 = vpack.c.bf16 %v24_v47, %v23_v46  ;;  %v1018_v62 = vpack.c.bf16 %v26_v56, %v25_v55  ;;  %v27_v2 = vld [vmem:[%s1345_s0 + $0x60] sm:$0xff]  ;;  %v36_v16 = vld [vmem:[%s1345_s0 + $0xa8] sm:$0xff]  ;;  %v53_v55 = vld [vmem:[%s1345_s0 + $0x130] sm:$0xff] }
   0x9   :  { %v1194_v45 = vsub.s32 %v467_v41, %v469_v42  ;;  %v35_v15 = vld [vmem:[%s1345_s0 + $0xa0] sm:$0xff]  ;;  %v40_v37 = vld [vmem:[%s1345_s0 + $0xc8] sm:$0xff]  ;;  %v54_v56 = vld [vmem:[%s1345_s0 + $0x138] sm:$0xff] }
   0xa   :  { %v44_v41 = vld [vmem:[%s1345_s0 + $0xe8] sm:$0xff]  ;;  %v47_v46 = vld [vmem:[%s1345_s0 + $0x100] sm:$0xff] }
   0xb   :  { %v48_v47 = vld [vmem:[%s1345_s0 + $0x108] sm:$0xff] }
  0xd8   :  { %v137_v3 = vpop.f32.mrb[0].mxu1 }
  0xd9   :  { %v141_v5 = vmul.f32 0.25, %v137_v3  ;;  %v889_v6 = vpop.f32.mrb[1].mxu1  ;;  %v28_v3 = vld [vmem:[%s1345_s0 + $0x68] sm:$0xff] }
  0xda   :  { %v29_v6 = vld [vmem:[%s1345_s0 + $0x70] sm:$0xff] }
  0xdb   :  { %v145_v7 = vadd.f32 %v144_v4, %v141_v5 }
  0xdd   :  { %1069 = vrcp.f32 %v145_v7  ;;  %813 = vst.msk [vmem:[%s1347_s3 + $0x6] sm:$0x3] %vm812_vm2, %v145_v7 }
  0xde   :  { %1071 = vrcp.f32 %v62_v8 }
  0xe7   :  { %v1070_v9 = vpop.eup %1069 }
  0xe8   :  { %v147_v10 = vmul.f32 %v1070_v9, %v145_v7  ;;  %v1072_v12 = vpop.eup %1071  ;;  %v30_v7 = vld [vmem:[%s1345_s0 + $0x78] sm:$0xff] }
  0xe9   :  { %v143_v17 = vmul.f32 %v1072_v12, %v141_v5  ;;  %v1021_v5 = vpack.c.bf16 %v28_v3, %v27_v2  ;;  %v1024_v8 = vpack.c.bf16 %v30_v7, %v29_v6 }
  0xea   :  { %v148_v11 = vsub.f32 2.0, %v147_v10  ;;  %v32_v10 = vld [vmem:[%s1345_s0 + $0x88] sm:$0xff] }
  0xec   :  { %v149_v13 = vmul.f32 %v1070_v9, %v148_v11  ;;  %v31_v9 = vld [vmem:[%s1345_s0 + $0x80] sm:$0xff]  ;;  %v33_v11 = vld [vmem:[%s1345_s0 + $0x90] sm:$0xff] }
  0xed   :  { %v1027_v12 = vpack.c.bf16 %v32_v10, %v31_v9 }
  0xee   :  { %893 = vmatmul.mubr.msk.f32.vlgmr.msra.gmra.mrb[2].mxu1 %vm150_vm3, %v149_v13  ;;  %v229_v18 = vrot.slane %v149_v13, 6  ;;  %v34_v13 = vld [vmem:[%s1345_s0 + $0x98] sm:$0xff] }
  0xef   :  { %896 = vmatpush3.msra.mxu1 %v55_v14  ;;  %897 = vmatprep.mubr.msk.f32.mxu1 %vm1080_vm1, %v1079_v0  ;;  %v1030_v14 = vpack.c.bf16 %v34_v13, %v33_v11 }
  0xf0   :  { %1002 = vmatprep.subr.bf16.mxu1 %v1081_v20  ;;  %v232_v21 = vsel %vm231_vm4, %v143_v17, %v229_v18  ;;  %v1033_v17 = vpack.c.bf16 %v36_v16, %v35_v15  ;;  %v37_v18 = vld [vmem:[%s1345_s0 + $0xb0] sm:$0xff] }
  0xf2   :  { %898 = vmatmul.mubr.msk.f32.vlgmr.msra.gmra.mrb[4].mxu1 %vm150_vm3, %v232_v21 }
  0xf3   :  { %1004 = vmatpush3.bf16.msra.mxu1 %v1003_v19  ;;  %921 = vmatprep.mubr.msk.f32.mxu1 %vm1080_vm1, %v1079_v0  ;;  %v38_v19 = vld [vmem:[%s1345_s0 + $0xb8] sm:$0xff] }
  0xf4   :  { %1005 = vmatprep.subr.bf16.mxu1 %v1081_v20  ;;  %v1036_v21 = vpack.c.bf16 %v38_v19, %v37_v18 }
  0xf7   :  { %1007 = vmatpush3.bf16.msra.mxu1 %v1006_v24 }
  0xf8   :  { %1008 = vmatprep.subr.bf16.mxu1 %v1081_v20 }
  0xfb   :  { %1010 = vmatpush3.bf16.msra.mxu1 %v1009_v27 }
  0xfc   :  { %1011 = vmatprep.subr.bf16.mxu1 %v1081_v20 }
  0xff   :  { %1013 = vmatpush3.bf16.msra.mxu1 %v1012_v30 }
 0x100   :  { %1026 = vmatprep.subr.bf16.mxu1 %v1081_v20 }
 0x102   :  { %922 = vmatmul.mubr.msk.f32.vlgmr.msra.gmra.mrb[6].mxu1 %vm387_vm5, %v1180_v31 }
 0x103   :  { %959 = vmatprep.mubr.msk.f32.mxu1 %vm1080_vm1, %v1079_v0  ;;  %1028 = vmatpush3.bf16.msra.mxu1 %v1027_v12 }
 0x104   :  { %1029 = vmatprep.subr.bf16.mxu1 %v1081_v20 }
 0x107   :  { %1031 = vmatpush3.bf16.msra.mxu1 %v1030_v14 }
 0x108   :  { %1032 = vmatprep.subr.bf16.mxu1 %v1081_v20 }
 0x10b   :  { %1034 = vmatpush3.bf16.msra.mxu1 %v1033_v17 }
 0x10c   :  { %1035 = vmatprep.subr.bf16.mxu1 %v1081_v20 }
 0x10f   :  { %1037 = vmatpush3.bf16.msra.mxu1 %v1036_v21 }
 0x110   :  { %997 = vmatprep.subr.mxu1 %v1079_v0 }
 0x1c1   :  { %v220_v33 = vpop.f32.mrb[2].mxu1 }
 0x1c2   :  { %1073 = vrcp.f32 %v220_v33  ;;  %v894_v34 = vpop.f32.mrb[3].mxu1  ;;  %v307_v50 = vrot.slane %v220_v33, 6 }
 0x1c5   :  { %v302_v35 = vpop.f32.mrb[4].mxu1 }
 0x1c6   :  { %v899_v36 = vpop.f32.mrb[5].mxu1  ;;  %v471_v54 = vrot.slane %v302_v35, %v1194_v45  ;;  %v462_v59 = vmul.f32 %v302_v35, %v60_v51 }
 0x1c8   :  { %v472_v63 = vcombine.high %v471_v54, %v471_v54 }
 0x1cc   :  { %v1074_v40 = vpop.eup %1073 }
 0x1cd   :  { %v225_v43 = vmul.f32 %v1074_v40, %v220_v33 }
 0x1cf   :  { %v226_v44 = vsub.f32 2.0, %v225_v43  ;;  %v45_v43 = vld [vmem:[%s1345_s0 + $0xf0] sm:$0xff] }
 0x1d1   :  { %v227_v48 = vmul.f32 %v1074_v40, %v226_v44  ;;  %v43_v40 = vld [vmem:[%s1345_s0 + $0xe0] sm:$0xff]  ;;  %v46_v44 = vld [vmem:[%s1345_s0 + $0xf8] sm:$0xff] }
 0x1d2   :  { %v1045_v42 = vpack.c.bf16 %v44_v41, %v43_v40 }
 0x1d3   :  { %v228_v49 = vmul.f32 2.0, %v227_v48  ;;  %v1051_v48 = vpack.c.bf16 %v48_v47, %v47_v46 }
 0x1d5   :  { %v457_v57 = vpop.f32.mrb[6].mxu1  ;;  %v309_v58 = vsel %vm231_vm4, %v228_v49, %v307_v50  ;;  %v49_v49 = vld [vmem:[%s1345_s0 + $0x110] sm:$0xff]  ;;  %v50_v50 = vld [vmem:[%s1345_s0 + $0x118] sm:$0xff] }
 0x1d6   :  { %v461_v60 = vsub.f32 %v59_v52, %v457_v57  ;;  %903 = vmatmul.mubr.msk.f32.vlgmr.msra.gmra.mrb[0].mxu0 %vm64_vm0, %v309_v58  ;;  %v923_v61 = vpop.f32.mrb[7].mxu1  ;;  %v1054_v51 = vpack.c.bf16 %v50_v50, %v49_v49  ;;  %v51_v52 = vld [vmem:[%s1345_s0 + $0x120] sm:$0xff]  ;;  %v1060_v57 = vpack.c.bf16 %v54_v56, %v53_v55 }
 0x1d7   :  { %1016 = vmatpush3.bf16.msra.mxu0 %v1015_v53  ;;  %940 = vmatprep.mubr.msk.f32.mxu0 %vm1080_vm1, %v1079_v0  ;;  %v52_v53 = vld [vmem:[%s1345_s0 + $0x128] sm:$0xff] }
 0x1d8   :  { %v463_v1 = vadd.f32 %v462_v59, %v461_v60  ;;  %1017 = vmatprep.subr.bf16.mxu0 %v1081_v20  ;;  %v1057_v54 = vpack.c.bf16 %v52_v53, %v51_v52 }
 0x1da   :  { %v474_v4 = vmul.f32 %v472_v63, %v463_v1  ;;  %809 = vst.msk [vmem:[%s1347_s3] sm:$0x3] %vm808_vm7, %v463_v1 }
 0x1db   :  { %1019 = vmatpush3.bf16.msra.mxu0 %v1018_v62 }
 0x1dc   :  { %1020 = vmatprep.subr.bf16.mxu0 %v1081_v20 }
 0x1df   :  { %1022 = vmatpush3.bf16.msra.mxu0 %v1021_v5 }
 0x1e0   :  { %1023 = vmatprep.subr.bf16.mxu0 %v1081_v20 }
 0x1e3   :  { %1025 = vmatpush3.bf16.msra.mxu0 %v1024_v8 }
 0x1e4   :  { %1038 = vmatprep.subr.bf16.mxu0 %v1081_v20 }
 0x1e6   :  { %941 = vmatmul.mubr.msk.f32.vlgmr.msra.gmra.mrb[2].mxu0 %vm387_vm5, %v474_v4 }
 0x1e7   :  { %994 = vmatprep.mubr.msk.f32.mxu0 %vm1080_vm1, %v1079_v0 }
 0x2a9   :  { %v383_v22 = vpop.f32.mrb[0].mxu0 }
 0x2aa   :  { %v904_v23 = vpop.f32.mrb[1].mxu0  ;;  %v557_v24 = vrot.slane %v383_v22, %v1194_v45  ;;  %v1048_v45 = vpack.c.bf16 %v46_v44, %v45_v43 }
 0x2ac   :  { %v558_v28 = vcombine.high %v557_v24, %v557_v24 }
 0x2b9   :  { %v544_v25 = vpop.f32.mrb[2].mxu0 }
 0x2ba   :  { %v548_v26 = vmul.f32 %v544_v25, %v383_v22  ;;  %v942_v27 = vpop.f32.mrb[3].mxu0 }
 0x2bc   :  { %v549_v29 = vadd.f32 %v548_v26, %v1180_v31  ;;  %v39_v31 = vld [vmem:[%s1345_s0 + $0xc0] sm:$0xff] }
 0x2bd   :  { %v1039_v38 = vpack.c.bf16 %v40_v37, %v39_v31 }
 0x2be   :  { %v560_v30 = vmul.f32 %v558_v28, %v549_v29  ;;  %810 = vst.msk [vmem:[%s1347_s3 + $0x2] sm:$0x3] %vm808_vm7, %v549_v29 }
 0x2bf   :  { %1040 = vmatpush3.bf16.msra.mxu0 %v1039_v38 }
 0x2c0   :  { %960 = vmatmul.mubr.msk.f32.vlgmr.msra.gmra.mrb[8].mxu1 %vm387_vm5, %v560_v30  ;;  %1041 = vmatprep.subr.bf16.mxu0 %v1081_v20 }
 0x2c1   :  { %998 = vmatpush3.xpose.msk.msra.mxu1 %vm387_vm5, %v1190_v32  ;;  %999 = vmatprep.mubr.msk.f32.mxu1 %vm1080_vm1, %v1079_v0  ;;  %v41_v32 = vld [vmem:[%s1345_s0 + $0xd0] sm:$0xff]  ;;  %v42_v0 = vld [vmem:[%s1345_s0 + $0xd8] sm:$0xff]  ;;  %s1083_s0 = smov 64  }
 0x2c2   :  { %v1042_v39 = vpack.c.bf16 %v42_v0, %v41_v32 }
 0x2c4   :  { %1043 = vmatpush3.bf16.msra.mxu0 %v1042_v39 }
 0x2c5   :  { %1044 = vmatprep.subr.bf16.mxu0 %v1081_v20 }
 0x2c8   :  { %1046 = vmatpush3.bf16.msra.mxu0 %v1045_v42 }
 0x2c9   :  { %1047 = vmatprep.subr.bf16.mxu0 %v1081_v20 }
 0x2cc   :  { %1049 = vmatpush3.bf16.msra.mxu0 %v1048_v45 }
 0x2cd   :  { %1050 = vmatprep.subr.bf16.mxu0 %v1081_v20 }
 0x2d0   :  { %1052 = vmatpush3.bf16.msra.mxu0 %v1051_v48 }
 0x2d1   :  { %1053 = vmatprep.subr.bf16.mxu0 %v1081_v20 }
 0x2d4   :  { %1055 = vmatpush3.bf16.msra.mxu0 %v1054_v51 }
 0x2d5   :  { %1056 = vmatprep.subr.bf16.mxu0 %v1081_v20 }
 0x2d8   :  { %1058 = vmatpush3.bf16.msra.mxu0 %v1057_v54 }
 0x2d9   :  { %1059 = vmatprep.subr.bf16.mxu0 %v1081_v20 }
 0x2dc   :  { %1061 = vmatpush3.bf16.msra.mxu0 %v1060_v57 }
 0x393   :  { %v630_v33 = vpop.f32.mrb[8].mxu1 }
 0x394   :  { %v961_v34 = vpop.f32.mrb[9].mxu1  ;;  %v634_v35 = vand.u32 2147483647, %v630_v33 }
 0x396   :  { %v635_v36 = vsel %vm231_vm4, %v634_v35, -inf }
 0x397   :  { %636 = vmax.xlane.f32.xlu0 %v635_v36 }
 0x424   :  { %v637_v58 = vpop.xlane.xlu0 %636 }
 0x425   :  { %v638_v59 = vrot.slane %v637_v58, 4 }
 0x427   :  { %v639_v60 = vmax.f32 %v637_v58, %v638_v59 }
 0x429   :  { %v640_v61 = vrot.slane %v639_v60, 2 }
 0x42b   :  { %v641_v62 = vmax.f32 %v639_v60, %v640_v61 }
 0x42d   :  { %v642_v63 = vrot.slane %v641_v62, 1 }
 0x42f   :  { %v643_v1 = vmax.f32 %v641_v62, %v642_v63 }
 0x431   :  { %1062 = vpush %v643_v1 }
 0x462   :  { %s1063_s5 = spop %1062 }
 0x463   :  { %v645_v2 = vstv %s1063_s5 }
 0x464   :  { %v646_v3 = vsub.f32 %v630_v33, %v645_v2 }
 0x466   :  { %v647_v4 = vmul.f32 1.442695, %v646_v3 }
 0x468   :  { %1075 = vpow2.f32 %v647_v4 }
 0x472   :  { %v1076_v5 = vpop.eup %1075 }
 0x473   :  { %995 = vmatmul.mubr.f32.vlgmr.msra.gmra.mrb[4].mxu0 %v1076_v5 }
 0x546   :  { %v715_v6 = vpop.f32.mrb[4].mxu0 }
 0x547   :  { %1077 = vrcp.f32 %v715_v6  ;;  %v996_v7 = vpop.f32.mrb[5].mxu0 }
 0x551   :  { %v1078_v20 = vpop.eup %1077 }
 0x552   :  { %v720_v8 = vmul.f32 %v1078_v20, %v715_v6 }
 0x554   :  { %v721_v9 = vsub.f32 2.0, %v720_v8 }
 0x556   :  { %v722_v10 = vmul.f32 %v1078_v20, %v721_v9 }
 0x558   :  { %724 = vrot.lane.b32.xlu0 %v722_v10, %s1083_s0 }
 0x5ca   :  { %v725_v11 = vpop.permute.xlu0 %724 }
 0x5cb   :  { %v727_v12 = vmul.f32 %v725_v11, %v715_v6 }
 0x5cd   :  { %v728_v13 = vmul.f32 %v727_v12, %v727_v12  ;;  %811 = vst.msk [vmem:[%s1347_s3 + $0x4] sm:$0x3] %vm808_vm7, %v727_v12 }
 0x5cf   :  { %1000 = vmatmul.mubr.msk.f32.vlgmr.msra.gmra.mrb[10].mxu1 %vm387_vm5, %v728_v13 }
 0x6a2   :  { %v800_v14 = vpop.f32.mrb[10].mxu1 }
 0x6a3   :  { %v804_v15 = vmul.f32 0.5, %v800_v14  ;;  %v1001_v16 = vpop.f32.mrb[11].mxu1 }
 0x6a5   :  { %v805_v17 = vsub.f32 1.0, %v804_v15 }
 0x6a7   :  { %815 = vst.msk [vmem:[%s1347_s3 + $0x8] sm:$0x3] %vm814_vm8, %v805_v17 }

</bundles_post_ra>
